<compile_context>
chip_gen: v6e
topology: v6e:2x2x1
jax: 0.10.0
libtpu: 0.0.40
codegen_flags: <defaults>
</compile_context>

<pallas_src>
import functools
import math

import jax
import jax.numpy as jnp
from jax.experimental import pallas as pl
from jax.experimental.pallas import tpu as pltpu


# ----------------------------- fused kernel --------------------------------

def _fused_resnet_kernel(x_ref, w_in_ref, b_in_ref, w_blk_ref, b_blk_ref,
                         w_out_ref, b_out_ref, o_ref, *, num_blocks, seq_len):
    """Whole network on one (NB*L, C) channels-last activation slab in VMEM.

    x_ref:     (M, Cin)               M = NB * seq_len rows (NB sequences)
    w_in_ref:  (3, Cin, H)      bf16  k=3 input conv, tap-major
    b_in_ref:  (1, H)           f32
    w_blk_ref: (6*num_blocks, H, H) bf16  [conv, tap] flattened on axis 0
    b_blk_ref: (2*num_blocks, 1, H) f32
    w_out_ref: (H, Cout)        bf16  1x1 output conv
    b_out_ref: (1, Cout)        f32
    o_ref:     (M, Cout)
    """
    rows = x_ref.shape[0]
    hidden = w_in_ref.shape[-1]

    # Sequence-edge masks for the k=3 halo, hoisted once and reused by every
    # conv (broadcasts are not CSE'd inside the unrolled block loop).
    l_idx = jax.lax.broadcasted_iota(jnp.int32, (rows, hidden), 0) % seq_len
    not_first = l_idx != 0
    not_last = l_idx != (seq_len - 1)

    def conv3(hb, w0, w1, w2, bias):
        # y[l] = W0 x[l-1] + W1 x[l] + W2 x[l+1] + b   (zero-padded at edges)
        # Three un-shifted MXU matmuls; tap alignment is done on the outputs
        # with XLU rolls + edge masks (the masks also kill the circular wrap
        # and cross-sequence leakage of the flattened row dimension).
        t0 = jnp.dot(hb, w0, preferred_element_type=jnp.float32)
        t1 = jnp.dot(hb, w1, preferred_element_type=jnp.float32)
        t2 = jnp.dot(hb, w2, preferred_element_type=jnp.float32)
        y = t1 + jnp.where(not_first, pltpu.roll(t0, shift=1, axis=0), 0.0)
        y = y + jnp.where(not_last, pltpu.roll(t2, shift=rows - 1, axis=0), 0.0)
        return y + bias

    x = x_ref[...].astype(jnp.bfloat16)

    # Input layer (no activation).
    h = conv3(x, w_in_ref[0], w_in_ref[1], w_in_ref[2], b_in_ref[...])

    # Residual blocks: residual branch + inter-layer activations stay in VMEM.
    # TODO(synk): switch to lax.fori_loop with dynamic w_blk_ref indexing if
    # num_blocks grows beyond a handful (bounds live ranges / compile time).
    for i in range(num_blocks):
        r = h
        j = 6 * i
        h = conv3(h.astype(jnp.bfloat16),
                  w_blk_ref[j + 0], w_blk_ref[j + 1], w_blk_ref[j + 2],
                  b_blk_ref[2 * i])
        h = jnp.maximum(h, 0.0)
        h = conv3(h.astype(jnp.bfloat16),
                  w_blk_ref[j + 3], w_blk_ref[j + 4], w_blk_ref[j + 5],
                  b_blk_ref[2 * i + 1])
        h = jnp.maximum(h + r, 0.0)

    # 1x1 output conv == per-row matmul; f32 epilogue, single store.
    y = jnp.dot(h.astype(jnp.bfloat16), w_out_ref[...],
                preferred_element_type=jnp.float32) + b_out_ref[...]
    o_ref[...] = y.astype(o_ref.dtype)


# ------------------------------ wrapper -------------------------------------

def _vmem_budget_bytes():
    """Generation-aware scoped-VMEM budget: v5e/v6e (128 MiB) -> ~96 MiB,
    v7x (64 MiB per TC) -> 48 MiB, with a conservative fallback."""
    try:
        cap = int(pltpu.get_tpu_info().vmem_capacity_bytes)
    except Exception:
        cap = 64 * 1024 * 1024
    return max(32 * 1024 * 1024, min(cap * 3 // 4, 112 * 1024 * 1024))


def _pick_batch_tile(N, L, Cin, H, Cout, vmem_budget):
    """Sequences per grid step: fill a good chunk of the VMEM budget while
    keeping >=2 (preferably an even number of) grid steps for megacore/v7x."""
    # Rough live bytes per sequence inside the kernel: ~7 f32 activation-sized
    # temporaries (h, r, 3 tap outputs, 2 rolled/masked) + one bf16 copy of h,
    # plus the double-buffered in/out tiles.
    per_seq = L * (7 * H * 4 + H * 2 + 2 * 4 * (Cin + Cout)) + 4096
    nb = max(1, min(N, (vmem_budget // 2) // per_seq))
    if N >= 2:
        nb = min(nb, N // 2)          # at least 2 grid steps when possible
    nb = max(1, nb)
    while N % nb:
        nb -= 1
    # Prefer an even step count so both v7x TensorCores get balanced work,
    # but never shrink the tile by more than ~2x for it.
    if nb > 1 and (N // nb) % 2:
        cand = nb - 1
        while cand >= max(1, nb // 2):
            if N % cand == 0 and (N // cand) % 2 == 0:
                nb = cand
                break
            cand -= 1
    # Mosaic (8,128) rule: block rows must be a multiple of 8 unless the block
    # covers the whole array.
    if (nb * L) % 8 != 0:
        nb = N
    return nb


def simple_resnet_forward(x_ncl, params):
    """Matches SimpleResNet.forward. x_ncl: (N, C_in, L) -> (N, C_out, L)."""
    N, Cin, L = x_ncl.shape
    w_in, b_in = params["input"]
    H = w_in.shape[0]
    num_blocks = len(params["blocks"])
    w_out, b_out = params["output"]
    Cout = w_out.shape[0]

    # --- pack weights once: tap-major, channels-last, bf16 MXU operands -----
    def taps(w):  # PyTorch Conv1d weight (Cout, Cin, K) -> (K, Cin, Cout)
        return jnp.transpose(w, (2, 1, 0))

    w_in_p = taps(w_in).astype(jnp.bfloat16)                          # (3, Cin, H)
    b_in_p = b_in.reshape(1, H).astype(jnp.float32)
    w_blk_p = jnp.concatenate(
        [taps(w) for blk in params["blocks"] for (w, _) in blk],
        axis=0).astype(jnp.bfloat16)                                  # (6*nb, H, H)
    b_blk_p = jnp.stack(
        [b.reshape(1, H) for blk in params["blocks"] for (_, b) in blk]
    ).astype(jnp.float32)                                             # (2*nb, 1, H)
    w_out_p = jnp.transpose(w_out[:, :, 0], (1, 0)).astype(jnp.bfloat16)  # (H, Cout)
    b_out_p = b_out.reshape(1, Cout).astype(jnp.float32)

    # --- lane-dense channels-last I/O: layout plumbing stays in XLA ---------
    x_rows = jnp.transpose(x_ncl, (0, 2, 1)).reshape(N * L, Cin)

    vmem_budget = _vmem_budget_bytes()
    NB = _pick_batch_tile(N, L, Cin, H, Cout, vmem_budget)
    grid = (N // NB,)
    rows = NB * L

    flops = 2 * N * L * (3 * Cin * H + num_blocks * 2 * 3 * H * H + H * Cout)
    bytes_accessed = (N * L * Cin * 4 + N * L * Cout * 4
                      + (w_in_p.size + w_blk_p.size + w_out_p.size) * 2
                      + (b_in_p.size + b_blk_p.size + b_out_p.size) * 4)

    kernel = functools.partial(_fused_resnet_kernel,
                               num_blocks=num_blocks, seq_len=L)
    # TODO(synk): at realistic hidden sizes, single-buffer the constant
    # weight/bias blocks (pipeline_mode=pl.Buffered(1)) to halve their VMEM.
    y_rows = pl.pallas_call(
        kernel,
        out_shape=jax.ShapeDtypeStruct((N * L, Cout), x_ncl.dtype),
        grid=grid,
        in_specs=[
            pl.BlockSpec((rows, Cin), lambda n: (n, 0)),
            pl.BlockSpec((3, Cin, H), lambda n: (0, 0, 0)),
            pl.BlockSpec((1, H), lambda n: (0, 0)),
            pl.BlockSpec((6 * num_blocks, H, H), lambda n: (0, 0, 0)),
            pl.BlockSpec((2 * num_blocks, 1, H), lambda n: (0, 0, 0)),
            pl.BlockSpec((H, Cout), lambda n: (0, 0)),
            pl.BlockSpec((1, Cout), lambda n: (0, 0)),
        ],
        out_specs=pl.BlockSpec((rows, Cout), lambda n: (n, 0)),
        compiler_params=pltpu.CompilerParams(
            dimension_semantics=("parallel",),
            vmem_limit_bytes=int(vmem_budget),
        ),
        cost_estimate=pl.CostEstimate(
            flops=int(flops), transcendentals=0,
            bytes_accessed=int(bytes_accessed)),
    )(x_rows, w_in_p, b_in_p, w_blk_p, b_blk_p, w_out_p, b_out_p)

    return jnp.transpose(y_rows.reshape(N, L, Cout), (0, 2, 1))


# --------------------------- parameter setup --------------------------------

def _init_conv(key, cout, cin, k):
    # Mimics PyTorch Conv1d default init (uniform +/- 1/sqrt(fan_in)).
    bound = 1.0 / math.sqrt(cin * k)
    kw, kb = jax.random.split(key)
    w = jax.random.uniform(kw, (cout, cin, k), jnp.float32, -bound, bound)
    b = jax.random.uniform(kb, (cout,), jnp.float32, -bound, bound)
    return w, b  # PyTorch layout: (Cout, Cin, K)


def init_simple_resnet(key, input_dim, hidden_dim, output_dim, num_blocks=3):
    keys = jax.random.split(key, 2 + 2 * num_blocks)
    params = {"input": _init_conv(keys[0], hidden_dim, input_dim, 3)}
    params["blocks"] = []
    for i in range(num_blocks):
        w1 = _init_conv(keys[1 + 2 * i], hidden_dim, hidden_dim, 3)
        w2 = _init_conv(keys[2 + 2 * i], hidden_dim, hidden_dim, 3)
        params["blocks"].append((w1, w2))
    params["output"] = _init_conv(keys[-1], output_dim, hidden_dim, 1)
    return params


# ------------------------------ reference ------------------------------------

def _conv1d_ref(x_ncl, w_oik, b, padding):
    y = jax.lax.conv_general_dilated(
        x_ncl, w_oik, window_strides=(1,), padding=[(padding, padding)],
        dimension_numbers=("NCH", "OIH", "NCH"))
    return y + b[None, :, None]


def simple_resnet_ref(x_ncl, params):
    w, b = params["input"]
    x = _conv1d_ref(x_ncl, w, b, 1)
    for (w1, b1), (w2, b2) in params["blocks"]:
        r = x
        x = jax.nn.relu(_conv1d_ref(x, w1, b1, 1))
        x = _conv1d_ref(x, w2, b2, 1)
        x = jax.nn.relu(x + r)
    w, b = params["output"]
    return _conv1d_ref(x, w, b, 0)


# --------------------------------- main --------------------------------------

if __name__ == "__main__":
    N, C_IN, HIDDEN, C_OUT, L = 2, 4, 32, 4, 16

    key = jax.random.PRNGKey(0)
    k_params, k_x = jax.random.split(key)
    params = init_simple_resnet(k_params, C_IN, HIDDEN, C_OUT, num_blocks=3)
    x = jax.random.normal(k_x, (N, C_IN, L), jnp.float32)

    fwd = jax.jit(simple_resnet_forward)
    out = jax.block_until_ready(fwd(x, params))

    ref = jax.block_until_ready(simple_resnet_ref(x, params))
    assert out.shape == (N, C_OUT, L), out.shape
    # bf16 MXU operands with f32 accumulation: slightly looser tolerance.
    err = float(jnp.max(jnp.abs(out - ref)))
    assert jnp.allclose(out, ref, atol=5e-2, rtol=5e-2), err

    print("KERNEL_OK")
</pallas_src>

<mosaic_0001>
module attributes {stable_mosaic.version = 11 : i64} {
  func.func @_fused_resnet_kernel(%arg0: i32, %arg1: memref<16x4xf32, #tpu.memory_space<vmem>>, %arg2: memref<3x4x32xbf16, #tpu.memory_space<vmem>>, %arg3: memref<1x32xf32, #tpu.memory_space<vmem>>, %arg4: memref<18x32x32xbf16, #tpu.memory_space<vmem>>, %arg5: memref<6x1x32xf32, #tpu.memory_space<vmem>>, %arg6: memref<32x4xbf16, #tpu.memory_space<vmem>>, %arg7: memref<1x4xf32, #tpu.memory_space<vmem>>, %arg8: memref<16x4xf32, #tpu.memory_space<vmem>>) attributes {dimension_semantics = [#tpu.dimension_semantics<parallel>], iteration_bounds = array<i64: 2>, scalar_prefetch = 0 : i64, scratch_operands = 0 : i64, tpu.core_type = #tpu.core_type<tc>, window_params = [{transform_indices = @transform_0, window_bounds = array<i64: 16, 4>}, {pipeline_mode = #tpu.pipeline_mode<synchronous>, transform_indices = @transform_1, window_bounds = array<i64: 3, 4, 32>}, {pipeline_mode = #tpu.pipeline_mode<synchronous>, transform_indices = @transform_2, window_bounds = array<i64: 1, 32>}, {pipeline_mode = #tpu.pipeline_mode<synchronous>, transform_indices = @transform_3, window_bounds = array<i64: 18, 32, 32>}, {pipeline_mode = #tpu.pipeline_mode<synchronous>, transform_indices = @transform_4, window_bounds = array<i64: 6, 1, 32>}, {pipeline_mode = #tpu.pipeline_mode<synchronous>, transform_indices = @transform_5, window_bounds = array<i64: 32, 4>}, {pipeline_mode = #tpu.pipeline_mode<synchronous>, transform_indices = @transform_6, window_bounds = array<i64: 1, 4>}, {transform_indices = @transform_7, window_bounds = array<i64: 16, 4>}]} {
    %0 = tpu.iota {dimensions = array<i32: 0>} : vector<16x32xi32>
    %c16_i32 = arith.constant 16 : i32
    %c0_i32 = arith.constant 0 : i32
    %1 = arith.cmpi eq, %c16_i32, %c0_i32 : i32
    %c1_i32 = arith.constant 1 : i32
    %2 = arith.select %1, %c1_i32, %c16_i32 : i32
    %3 = vector.broadcast %2 : i32 to vector<16x32xi32>
    %4 = arith.remsi %0, %3 : vector<16x32xi32>
    %c0_i32_0 = arith.constant 0 : i32
    %5 = vector.broadcast %c0_i32_0 : i32 to vector<16x32xi32>
    %6 = arith.cmpi ne, %4, %5 : vector<16x32xi32>
    %c0_i32_1 = arith.constant 0 : i32
    %7 = vector.broadcast %c0_i32_1 : i32 to vector<16x32xi32>
    %8 = arith.cmpi slt, %4, %7 : vector<16x32xi32>
    %c0_i32_2 = arith.constant 0 : i32
    %9 = arith.cmpi slt, %2, %c0_i32_2 : i32
    %10 = vector.broadcast %9 : i1 to vector<16x32xi1>
    %11 = vector.broadcast %10 : vector<16x32xi1> to vector<16x32xi1>
    %12 = arith.xori %8, %11 : vector<16x32xi1>
    %13 = arith.andi %12, %6 : vector<16x32xi1>
    %14 = vector.broadcast %2 : i32 to vector<16x32xi32>
    %15 = arith.addi %4, %14 : vector<16x32xi32>
    %16 = arith.select %13, %15, %4 : vector<16x32xi1>, vector<16x32xi32>
    %c0_i32_3 = arith.constant 0 : i32
    %17 = vector.broadcast %c0_i32_3 : i32 to vector<16x32xi32>
    %18 = arith.cmpi ne, %16, %17 : vector<16x32xi32>
    %c15_i32 = arith.constant 15 : i32
    %19 = vector.broadcast %c15_i32 : i32 to vector<16x32xi32>
    %20 = arith.cmpi ne, %16, %19 : vector<16x32xi32>
    %c0 = arith.constant 0 : index
    %c0_4 = arith.constant 0 : index
    %21 = vector.load %arg1[%c0, %c0_4] : memref<16x4xf32, #tpu.memory_space<vmem>>, vector<16x4xf32>
    %22 = arith.truncf %21 : vector<16x4xf32> to vector<16x4xbf16>
    %c0_5 = arith.constant 0 : index
    %c0_6 = arith.constant 0 : index
    %c0_7 = arith.constant 0 : index
    %23 = vector.load %arg2[%c0_5, %c0_6, %c0_7] : memref<3x4x32xbf16, #tpu.memory_space<vmem>>, vector<1x4x32xbf16>
    %24 = vector.shape_cast %23 : vector<1x4x32xbf16> to vector<4x32xbf16>
    %c1 = arith.constant 1 : index
    %c0_8 = arith.constant 0 : index
    %c0_9 = arith.constant 0 : index
    %25 = vector.load %arg2[%c1, %c0_8, %c0_9] : memref<3x4x32xbf16, #tpu.memory_space<vmem>>, vector<1x4x32xbf16>
    %26 = vector.shape_cast %25 : vector<1x4x32xbf16> to vector<4x32xbf16>
    %c2 = arith.constant 2 : index
    %c0_10 = arith.constant 0 : index
    %c0_11 = arith.constant 0 : index
    %27 = vector.load %arg2[%c2, %c0_10, %c0_11] : memref<3x4x32xbf16, #tpu.memory_space<vmem>>, vector<1x4x32xbf16>
    %28 = vector.shape_cast %27 : vector<1x4x32xbf16> to vector<4x32xbf16>
    %c0_12 = arith.constant 0 : index
    %c0_13 = arith.constant 0 : index
    %29 = vector.load %arg3[%c0_12, %c0_13] : memref<1x32xf32, #tpu.memory_space<vmem>>, vector<1x32xf32>
    %cst = arith.constant dense<0.000000e+00> : vector<16x32xf32>
    %30 = tpu.matmul %22, %24, %cst {dimension_numbers = #tpu.dot_dimension_numbers<[1], [0], [0], [1], [0, 0, 1, 1], [], []>} : vector<16x4xbf16>, vector<4x32xbf16>, vector<16x32xf32> -> vector<16x32xf32>
    %cst_14 = arith.constant dense<0.000000e+00> : vector<16x32xf32>
    %31 = tpu.matmul %22, %26, %cst_14 {dimension_numbers = #tpu.dot_dimension_numbers<[1], [0], [0], [1], [0, 0, 1, 1], [], []>} : vector<16x4xbf16>, vector<4x32xbf16>, vector<16x32xf32> -> vector<16x32xf32>
    %cst_15 = arith.constant dense<0.000000e+00> : vector<16x32xf32>
    %32 = tpu.matmul %22, %28, %cst_15 {dimension_numbers = #tpu.dot_dimension_numbers<[1], [0], [0], [1], [0, 0, 1, 1], [], []>} : vector<16x4xbf16>, vector<4x32xbf16>, vector<16x32xf32> -> vector<16x32xf32>
    %c1_i32_16 = arith.constant 1 : i32
    %33 = tpu.dynamic_rotate %30 by %c1_i32_16 dim 0 : vector<16x32xf32>, i32 -> vector<16x32xf32>
    %cst_17 = arith.constant 0.000000e+00 : f32
    %34 = vector.broadcast %cst_17 : f32 to vector<16x32xf32>
    %35 = arith.select %18, %33, %34 : vector<16x32xi1>, vector<16x32xf32>
    %36 = arith.addf %31, %35 : vector<16x32xf32>
    %c15_i32_18 = arith.constant 15 : i32
    %37 = tpu.dynamic_rotate %32 by %c15_i32_18 dim 0 : vector<16x32xf32>, i32 -> vector<16x32xf32>
    %cst_19 = arith.constant 0.000000e+00 : f32
    %38 = vector.broadcast %cst_19 : f32 to vector<16x32xf32>
    %39 = arith.select %20, %37, %38 : vector<16x32xi1>, vector<16x32xf32>
    %40 = arith.addf %36, %39 : vector<16x32xf32>
    %41 = vector.broadcast %29 : vector<1x32xf32> to vector<16x32xf32>
    %42 = arith.addf %40, %41 : vector<16x32xf32>
    %43 = arith.truncf %42 : vector<16x32xf32> to vector<16x32xbf16>
    %c0_20 = arith.constant 0 : index
    %c0_21 = arith.constant 0 : index
    %c0_22 = arith.constant 0 : index
    %44 = vector.load %arg4[%c0_20, %c0_21, %c0_22] : memref<18x32x32xbf16, #tpu.memory_space<vmem>>, vector<1x32x32xbf16>
    %45 = vector.shape_cast %44 : vector<1x32x32xbf16> to vector<32x32xbf16>
    %c1_23 = arith.constant 1 : index
    %c0_24 = arith.constant 0 : index
    %c0_25 = arith.constant 0 : index
    %46 = vector.load %arg4[%c1_23, %c0_24, %c0_25] : memref<18x32x32xbf16, #tpu.memory_space<vmem>>, vector<1x32x32xbf16>
    %47 = vector.shape_cast %46 : vector<1x32x32xbf16> to vector<32x32xbf16>
    %c2_26 = arith.constant 2 : index
    %c0_27 = arith.constant 0 : index
    %c0_28 = arith.constant 0 : index
    %48 = vector.load %arg4[%c2_26, %c0_27, %c0_28] : memref<18x32x32xbf16, #tpu.memory_space<vmem>>, vector<1x32x32xbf16>
    %49 = vector.shape_cast %48 : vector<1x32x32xbf16> to vector<32x32xbf16>
    %c0_29 = arith.constant 0 : index
    %c0_30 = arith.constant 0 : index
    %c0_31 = arith.constant 0 : index
    %50 = vector.load %arg5[%c0_29, %c0_30, %c0_31] : memref<6x1x32xf32, #tpu.memory_space<vmem>>, vector<1x1x32xf32>
    %51 = vector.shape_cast %50 : vector<1x1x32xf32> to vector<1x32xf32>
    %cst_32 = arith.constant dense<0.000000e+00> : vector<16x32xf32>
    %52 = tpu.matmul %43, %45, %cst_32 {dimension_numbers = #tpu.dot_dimension_numbers<[1], [0], [0], [1], [0, 0, 1, 1], [], []>} : vector<16x32xbf16>, vector<32x32xbf16>, vector<16x32xf32> -> vector<16x32xf32>
    %cst_33 = arith.constant dense<0.000000e+00> : vector<16x32xf32>
    %53 = tpu.matmul %43, %47, %cst_33 {dimension_numbers = #tpu.dot_dimension_numbers<[1], [0], [0], [1], [0, 0, 1, 1], [], []>} : vector<16x32xbf16>, vector<32x32xbf16>, vector<16x32xf32> -> vector<16x32xf32>
    %cst_34 = arith.constant dense<0.000000e+00> : vector<16x32xf32>
    %54 = tpu.matmul %43, %49, %cst_34 {dimension_numbers = #tpu.dot_dimension_numbers<[1], [0], [0], [1], [0, 0, 1, 1], [], []>} : vector<16x32xbf16>, vector<32x32xbf16>, vector<16x32xf32> -> vector<16x32xf32>
    %c1_i32_35 = arith.constant 1 : i32
    %55 = tpu.dynamic_rotate %52 by %c1_i32_35 dim 0 : vector<16x32xf32>, i32 -> vector<16x32xf32>
    %cst_36 = arith.constant 0.000000e+00 : f32
    %56 = vector.broadcast %cst_36 : f32 to vector<16x32xf32>
    %57 = arith.select %18, %55, %56 : vector<16x32xi1>, vector<16x32xf32>
    %58 = arith.addf %53, %57 : vector<16x32xf32>
    %c15_i32_37 = arith.constant 15 : i32
    %59 = tpu.dynamic_rotate %54 by %c15_i32_37 dim 0 : vector<16x32xf32>, i32 -> vector<16x32xf32>
    %cst_38 = arith.constant 0.000000e+00 : f32
    %60 = vector.broadcast %cst_38 : f32 to vector<16x32xf32>
    %61 = arith.select %20, %59, %60 : vector<16x32xi1>, vector<16x32xf32>
    %62 = arith.addf %58, %61 : vector<16x32xf32>
    %63 = vector.broadcast %51 : vector<1x32xf32> to vector<16x32xf32>
    %64 = arith.addf %62, %63 : vector<16x32xf32>
    %cst_39 = arith.constant 0.000000e+00 : f32
    %65 = vector.broadcast %cst_39 : f32 to vector<16x32xf32>
    %66 = arith.maximumf %64, %65 : vector<16x32xf32>
    %67 = arith.truncf %66 : vector<16x32xf32> to vector<16x32xbf16>
    %c3 = arith.constant 3 : index
    %c0_40 = arith.constant 0 : index
    %c0_41 = arith.constant 0 : index
    %68 = vector.load %arg4[%c3, %c0_40, %c0_41] : memref<18x32x32xbf16, #tpu.memory_space<vmem>>, vector<1x32x32xbf16>
    %69 = vector.shape_cast %68 : vector<1x32x32xbf16> to vector<32x32xbf16>
    %c4 = arith.constant 4 : index
    %c0_42 = arith.constant 0 : index
    %c0_43 = arith.constant 0 : index
    %70 = vector.load %arg4[%c4, %c0_42, %c0_43] : memref<18x32x32xbf16, #tpu.memory_space<vmem>>, vector<1x32x32xbf16>
    %71 = vector.shape_cast %70 : vector<1x32x32xbf16> to vector<32x32xbf16>
    %c5 = arith.constant 5 : index
    %c0_44 = arith.constant 0 : index
    %c0_45 = arith.constant 0 : index
    %72 = vector.load %arg4[%c5, %c0_44, %c0_45] : memref<18x32x32xbf16, #tpu.memory_space<vmem>>, vector<1x32x32xbf16>
    %73 = vector.shape_cast %72 : vector<1x32x32xbf16> to vector<32x32xbf16>
    %c1_46 = arith.constant 1 : index
    %c0_47 = arith.constant 0 : index
    %c0_48 = arith.constant 0 : index
    %74 = vector.load %arg5[%c1_46, %c0_47, %c0_48] : memref<6x1x32xf32, #tpu.memory_space<vmem>>, vector<1x1x32xf32>
    %75 = vector.shape_cast %74 : vector<1x1x32xf32> to vector<1x32xf32>
    %cst_49 = arith.constant dense<0.000000e+00> : vector<16x32xf32>
    %76 = tpu.matmul %67, %69, %cst_49 {dimension_numbers = #tpu.dot_dimension_numbers<[1], [0], [0], [1], [0, 0, 1, 1], [], []>} : vector<16x32xbf16>, vector<32x32xbf16>, vector<16x32xf32> -> vector<16x32xf32>
    %cst_50 = arith.constant dense<0.000000e+00> : vector<16x32xf32>
    %77 = tpu.matmul %67, %71, %cst_50 {dimension_numbers = #tpu.dot_dimension_numbers<[1], [0], [0], [1], [0, 0, 1, 1], [], []>} : vector<16x32xbf16>, vector<32x32xbf16>, vector<16x32xf32> -> vector<16x32xf32>
    %cst_51 = arith.constant dense<0.000000e+00> : vector<16x32xf32>
    %78 = tpu.matmul %67, %73, %cst_51 {dimension_numbers = #tpu.dot_dimension_numbers<[1], [0], [0], [1], [0, 0, 1, 1], [], []>} : vector<16x32xbf16>, vector<32x32xbf16>, vector<16x32xf32> -> vector<16x32xf32>
    %c1_i32_52 = arith.constant 1 : i32
    %79 = tpu.dynamic_rotate %76 by %c1_i32_52 dim 0 : vector<16x32xf32>, i32 -> vector<16x32xf32>
    %cst_53 = arith.constant 0.000000e+00 : f32
    %80 = vector.broadcast %cst_53 : f32 to vector<16x32xf32>
    %81 = arith.select %18, %79, %80 : vector<16x32xi1>, vector<16x32xf32>
    %82 = arith.addf %77, %81 : vector<16x32xf32>
    %c15_i32_54 = arith.constant 15 : i32
    %83 = tpu.dynamic_rotate %78 by %c15_i32_54 dim 0 : vector<16x32xf32>, i32 -> vector<16x32xf32>
    %cst_55 = arith.constant 0.000000e+00 : f32
    %84 = vector.broadcast %cst_55 : f32 to vector<16x32xf32>
    %85 = arith.select %20, %83, %84 : vector<16x32xi1>, vector<16x32xf32>
    %86 = arith.addf %82, %85 : vector<16x32xf32>
    %87 = vector.broadcast %75 : vector<1x32xf32> to vector<16x32xf32>
    %88 = arith.addf %86, %87 : vector<16x32xf32>
    %89 = arith.addf %88, %42 : vector<16x32xf32>
    %cst_56 = arith.constant 0.000000e+00 : f32
    %90 = vector.broadcast %cst_56 : f32 to vector<16x32xf32>
    %91 = arith.maximumf %89, %90 : vector<16x32xf32>
    %92 = arith.truncf %91 : vector<16x32xf32> to vector<16x32xbf16>
    %c6 = arith.constant 6 : index
    %c0_57 = arith.constant 0 : index
    %c0_58 = arith.constant 0 : index
    %93 = vector.load %arg4[%c6, %c0_57, %c0_58] : memref<18x32x32xbf16, #tpu.memory_space<vmem>>, vector<1x32x32xbf16>
    %94 = vector.shape_cast %93 : vector<1x32x32xbf16> to vector<32x32xbf16>
    %c7 = arith.constant 7 : index
    %c0_59 = arith.constant 0 : index
    %c0_60 = arith.constant 0 : index
    %95 = vector.load %arg4[%c7, %c0_59, %c0_60] : memref<18x32x32xbf16, #tpu.memory_space<vmem>>, vector<1x32x32xbf16>
    %96 = vector.shape_cast %95 : vector<1x32x32xbf16> to vector<32x32xbf16>
    %c8 = arith.constant 8 : index
    %c0_61 = arith.constant 0 : index
    %c0_62 = arith.constant 0 : index
    %97 = vector.load %arg4[%c8, %c0_61, %c0_62] : memref<18x32x32xbf16, #tpu.memory_space<vmem>>, vector<1x32x32xbf16>
    %98 = vector.shape_cast %97 : vector<1x32x32xbf16> to vector<32x32xbf16>
    %c2_63 = arith.constant 2 : index
    %c0_64 = arith.constant 0 : index
    %c0_65 = arith.constant 0 : index
    %99 = vector.load %arg5[%c2_63, %c0_64, %c0_65] : memref<6x1x32xf32, #tpu.memory_space<vmem>>, vector<1x1x32xf32>
    %100 = vector.shape_cast %99 : vector<1x1x32xf32> to vector<1x32xf32>
    %cst_66 = arith.constant dense<0.000000e+00> : vector<16x32xf32>
    %101 = tpu.matmul %92, %94, %cst_66 {dimension_numbers = #tpu.dot_dimension_numbers<[1], [0], [0], [1], [0, 0, 1, 1], [], []>} : vector<16x32xbf16>, vector<32x32xbf16>, vector<16x32xf32> -> vector<16x32xf32>
    %cst_67 = arith.constant dense<0.000000e+00> : vector<16x32xf32>
    %102 = tpu.matmul %92, %96, %cst_67 {dimension_numbers = #tpu.dot_dimension_numbers<[1], [0], [0], [1], [0, 0, 1, 1], [], []>} : vector<16x32xbf16>, vector<32x32xbf16>, vector<16x32xf32> -> vector<16x32xf32>
    %cst_68 = arith.constant dense<0.000000e+00> : vector<16x32xf32>
    %103 = tpu.matmul %92, %98, %cst_68 {dimension_numbers = #tpu.dot_dimension_numbers<[1], [0], [0], [1], [0, 0, 1, 1], [], []>} : vector<16x32xbf16>, vector<32x32xbf16>, vector<16x32xf32> -> vector<16x32xf32>
    %c1_i32_69 = arith.constant 1 : i32
    %104 = tpu.dynamic_rotate %101 by %c1_i32_69 dim 0 : vector<16x32xf32>, i32 -> vector<16x32xf32>
    %cst_70 = arith.constant 0.000000e+00 : f32
    %105 = vector.broadcast %cst_70 : f32 to vector<16x32xf32>
    %106 = arith.select %18, %104, %105 : vector<16x32xi1>, vector<16x32xf32>
    %107 = arith.addf %102, %106 : vector<16x32xf32>
    %c15_i32_71 = arith.constant 15 : i32
    %108 = tpu.dynamic_rotate %103 by %c15_i32_71 dim 0 : vector<16x32xf32>, i32 -> vector<16x32xf32>
    %cst_72 = arith.constant 0.000000e+00 : f32
    %109 = vector.broadcast %cst_72 : f32 to vector<16x32xf32>
    %110 = arith.select %20, %108, %109 : vector<16x32xi1>, vector<16x32xf32>
    %111 = arith.addf %107, %110 : vector<16x32xf32>
    %112 = vector.broadcast %100 : vector<1x32xf32> to vector<16x32xf32>
    %113 = arith.addf %111, %112 : vector<16x32xf32>
    %cst_73 = arith.constant 0.000000e+00 : f32
    %114 = vector.broadcast %cst_73 : f32 to vector<16x32xf32>
    %115 = arith.maximumf %113, %114 : vector<16x32xf32>
    %116 = arith.truncf %115 : vector<16x32xf32> to vector<16x32xbf16>
    %c9 = arith.constant 9 : index
    %c0_74 = arith.constant 0 : index
    %c0_75 = arith.constant 0 : index
    %117 = vector.load %arg4[%c9, %c0_74, %c0_75] : memref<18x32x32xbf16, #tpu.memory_space<vmem>>, vector<1x32x32xbf16>
    %118 = vector.shape_cast %117 : vector<1x32x32xbf16> to vector<32x32xbf16>
    %c10 = arith.constant 10 : index
    %c0_76 = arith.constant 0 : index
    %c0_77 = arith.constant 0 : index
    %119 = vector.load %arg4[%c10, %c0_76, %c0_77] : memref<18x32x32xbf16, #tpu.memory_space<vmem>>, vector<1x32x32xbf16>
    %120 = vector.shape_cast %119 : vector<1x32x32xbf16> to vector<32x32xbf16>
    %c11 = arith.constant 11 : index
    %c0_78 = arith.constant 0 : index
    %c0_79 = arith.constant 0 : index
    %121 = vector.load %arg4[%c11, %c0_78, %c0_79] : memref<18x32x32xbf16, #tpu.memory_space<vmem>>, vector<1x32x32xbf16>
    %122 = vector.shape_cast %121 : vector<1x32x32xbf16> to vector<32x32xbf16>
    %c3_80 = arith.constant 3 : index
    %c0_81 = arith.constant 0 : index
    %c0_82 = arith.constant 0 : index
    %123 = vector.load %arg5[%c3_80, %c0_81, %c0_82] : memref<6x1x32xf32, #tpu.memory_space<vmem>>, vector<1x1x32xf32>
    %124 = vector.shape_cast %123 : vector<1x1x32xf32> to vector<1x32xf32>
    %cst_83 = arith.constant dense<0.000000e+00> : vector<16x32xf32>
    %125 = tpu.matmul %116, %118, %cst_83 {dimension_numbers = #tpu.dot_dimension_numbers<[1], [0], [0], [1], [0, 0, 1, 1], [], []>} : vector<16x32xbf16>, vector<32x32xbf16>, vector<16x32xf32> -> vector<16x32xf32>
    %cst_84 = arith.constant dense<0.000000e+00> : vector<16x32xf32>
    %126 = tpu.matmul %116, %120, %cst_84 {dimension_numbers = #tpu.dot_dimension_numbers<[1], [0], [0], [1], [0, 0, 1, 1], [], []>} : vector<16x32xbf16>, vector<32x32xbf16>, vector<16x32xf32> -> vector<16x32xf32>
    %cst_85 = arith.constant dense<0.000000e+00> : vector<16x32xf32>
    %127 = tpu.matmul %116, %122, %cst_85 {dimension_numbers = #tpu.dot_dimension_numbers<[1], [0], [0], [1], [0, 0, 1, 1], [], []>} : vector<16x32xbf16>, vector<32x32xbf16>, vector<16x32xf32> -> vector<16x32xf32>
    %c1_i32_86 = arith.constant 1 : i32
    %128 = tpu.dynamic_rotate %125 by %c1_i32_86 dim 0 : vector<16x32xf32>, i32 -> vector<16x32xf32>
    %cst_87 = arith.constant 0.000000e+00 : f32
    %129 = vector.broadcast %cst_87 : f32 to vector<16x32xf32>
    %130 = arith.select %18, %128, %129 : vector<16x32xi1>, vector<16x32xf32>
    %131 = arith.addf %126, %130 : vector<16x32xf32>
    %c15_i32_88 = arith.constant 15 : i32
    %132 = tpu.dynamic_rotate %127 by %c15_i32_88 dim 0 : vector<16x32xf32>, i32 -> vector<16x32xf32>
    %cst_89 = arith.constant 0.000000e+00 : f32
    %133 = vector.broadcast %cst_89 : f32 to vector<16x32xf32>
    %134 = arith.select %20, %132, %133 : vector<16x32xi1>, vector<16x32xf32>
    %135 = arith.addf %131, %134 : vector<16x32xf32>
    %136 = vector.broadcast %124 : vector<1x32xf32> to vector<16x32xf32>
    %137 = arith.addf %135, %136 : vector<16x32xf32>
    %138 = arith.addf %137, %91 : vector<16x32xf32>
    %cst_90 = arith.constant 0.000000e+00 : f32
    %139 = vector.broadcast %cst_90 : f32 to vector<16x32xf32>
    %140 = arith.maximumf %138, %139 : vector<16x32xf32>
    %141 = arith.truncf %140 : vector<16x32xf32> to vector<16x32xbf16>
    %c12 = arith.constant 12 : index
    %c0_91 = arith.constant 0 : index
    %c0_92 = arith.constant 0 : index
    %142 = vector.load %arg4[%c12, %c0_91, %c0_92] : memref<18x32x32xbf16, #tpu.memory_space<vmem>>, vector<1x32x32xbf16>
    %143 = vector.shape_cast %142 : vector<1x32x32xbf16> to vector<32x32xbf16>
    %c13 = arith.constant 13 : index
    %c0_93 = arith.constant 0 : index
    %c0_94 = arith.constant 0 : index
    %144 = vector.load %arg4[%c13, %c0_93, %c0_94] : memref<18x32x32xbf16, #tpu.memory_space<vmem>>, vector<1x32x32xbf16>
    %145 = vector.shape_cast %144 : vector<1x32x32xbf16> to vector<32x32xbf16>
    %c14 = arith.constant 14 : index
    %c0_95 = arith.constant 0 : index
    %c0_96 = arith.constant 0 : index
    %146 = vector.load %arg4[%c14, %c0_95, %c0_96] : memref<18x32x32xbf16, #tpu.memory_space<vmem>>, vector<1x32x32xbf16>
    %147 = vector.shape_cast %146 : vector<1x32x32xbf16> to vector<32x32xbf16>
    %c4_97 = arith.constant 4 : index
    %c0_98 = arith.constant 0 : index
    %c0_99 = arith.constant 0 : index
    %148 = vector.load %arg5[%c4_97, %c0_98, %c0_99] : memref<6x1x32xf32, #tpu.memory_space<vmem>>, vector<1x1x32xf32>
    %149 = vector.shape_cast %148 : vector<1x1x32xf32> to vector<1x32xf32>
    %cst_100 = arith.constant dense<0.000000e+00> : vector<16x32xf32>
    %150 = tpu.matmul %141, %143, %cst_100 {dimension_numbers = #tpu.dot_dimension_numbers<[1], [0], [0], [1], [0, 0, 1, 1], [], []>} : vector<16x32xbf16>, vector<32x32xbf16>, vector<16x32xf32> -> vector<16x32xf32>
    %cst_101 = arith.constant dense<0.000000e+00> : vector<16x32xf32>
    %151 = tpu.matmul %141, %145, %cst_101 {dimension_numbers = #tpu.dot_dimension_numbers<[1], [0], [0], [1], [0, 0, 1, 1], [], []>} : vector<16x32xbf16>, vector<32x32xbf16>, vector<16x32xf32> -> vector<16x32xf32>
    %cst_102 = arith.constant dense<0.000000e+00> : vector<16x32xf32>
    %152 = tpu.matmul %141, %147, %cst_102 {dimension_numbers = #tpu.dot_dimension_numbers<[1], [0], [0], [1], [0, 0, 1, 1], [], []>} : vector<16x32xbf16>, vector<32x32xbf16>, vector<16x32xf32> -> vector<16x32xf32>
    %c1_i32_103 = arith.constant 1 : i32
    %153 = tpu.dynamic_rotate %150 by %c1_i32_103 dim 0 : vector<16x32xf32>, i32 -> vector<16x32xf32>
    %cst_104 = arith.constant 0.000000e+00 : f32
    %154 = vector.broadcast %cst_104 : f32 to vector<16x32xf32>
    %155 = arith.select %18, %153, %154 : vector<16x32xi1>, vector<16x32xf32>
    %156 = arith.addf %151, %155 : vector<16x32xf32>
    %c15_i32_105 = arith.constant 15 : i32
    %157 = tpu.dynamic_rotate %152 by %c15_i32_105 dim 0 : vector<16x32xf32>, i32 -> vector<16x32xf32>
    %cst_106 = arith.constant 0.000000e+00 : f32
    %158 = vector.broadcast %cst_106 : f32 to vector<16x32xf32>
    %159 = arith.select %20, %157, %158 : vector<16x32xi1>, vector<16x32xf32>
    %160 = arith.addf %156, %159 : vector<16x32xf32>
    %161 = vector.broadcast %149 : vector<1x32xf32> to vector<16x32xf32>
    %162 = arith.addf %160, %161 : vector<16x32xf32>
    %cst_107 = arith.constant 0.000000e+00 : f32
    %163 = vector.broadcast %cst_107 : f32 to vector<16x32xf32>
    %164 = arith.maximumf %162, %163 : vector<16x32xf32>
    %165 = arith.truncf %164 : vector<16x32xf32> to vector<16x32xbf16>
    %c15 = arith.constant 15 : index
    %c0_108 = arith.constant 0 : index
    %c0_109 = arith.constant 0 : index
    %166 = vector.load %arg4[%c15, %c0_108, %c0_109] : memref<18x32x32xbf16, #tpu.memory_space<vmem>>, vector<1x32x32xbf16>
    %167 = vector.shape_cast %166 : vector<1x32x32xbf16> to vector<32x32xbf16>
    %c16 = arith.constant 16 : index
    %c0_110 = arith.constant 0 : index
    %c0_111 = arith.constant 0 : index
    %168 = vector.load %arg4[%c16, %c0_110, %c0_111] : memref<18x32x32xbf16, #tpu.memory_space<vmem>>, vector<1x32x32xbf16>
    %169 = vector.shape_cast %168 : vector<1x32x32xbf16> to vector<32x32xbf16>
    %c17 = arith.constant 17 : index
    %c0_112 = arith.constant 0 : index
    %c0_113 = arith.constant 0 : index
    %170 = vector.load %arg4[%c17, %c0_112, %c0_113] : memref<18x32x32xbf16, #tpu.memory_space<vmem>>, vector<1x32x32xbf16>
    %171 = vector.shape_cast %170 : vector<1x32x32xbf16> to vector<32x32xbf16>
    %c5_114 = arith.constant 5 : index
    %c0_115 = arith.constant 0 : index
    %c0_116 = arith.constant 0 : index
    %172 = vector.load %arg5[%c5_114, %c0_115, %c0_116] : memref<6x1x32xf32, #tpu.memory_space<vmem>>, vector<1x1x32xf32>
    %173 = vector.shape_cast %172 : vector<1x1x32xf32> to vector<1x32xf32>
    %cst_117 = arith.constant dense<0.000000e+00> : vector<16x32xf32>
    %174 = tpu.matmul %165, %167, %cst_117 {dimension_numbers = #tpu.dot_dimension_numbers<[1], [0], [0], [1], [0, 0, 1, 1], [], []>} : vector<16x32xbf16>, vector<32x32xbf16>, vector<16x32xf32> -> vector<16x32xf32>
    %cst_118 = arith.constant dense<0.000000e+00> : vector<16x32xf32>
    %175 = tpu.matmul %165, %169, %cst_118 {dimension_numbers = #tpu.dot_dimension_numbers<[1], [0], [0], [1], [0, 0, 1, 1], [], []>} : vector<16x32xbf16>, vector<32x32xbf16>, vector<16x32xf32> -> vector<16x32xf32>
    %cst_119 = arith.constant dense<0.000000e+00> : vector<16x32xf32>
    %176 = tpu.matmul %165, %171, %cst_119 {dimension_numbers = #tpu.dot_dimension_numbers<[1], [0], [0], [1], [0, 0, 1, 1], [], []>} : vector<16x32xbf16>, vector<32x32xbf16>, vector<16x32xf32> -> vector<16x32xf32>
    %c1_i32_120 = arith.constant 1 : i32
    %177 = tpu.dynamic_rotate %174 by %c1_i32_120 dim 0 : vector<16x32xf32>, i32 -> vector<16x32xf32>
    %cst_121 = arith.constant 0.000000e+00 : f32
    %178 = vector.broadcast %cst_121 : f32 to vector<16x32xf32>
    %179 = arith.select %18, %177, %178 : vector<16x32xi1>, vector<16x32xf32>
    %180 = arith.addf %175, %179 : vector<16x32xf32>
    %c15_i32_122 = arith.constant 15 : i32
    %181 = tpu.dynamic_rotate %176 by %c15_i32_122 dim 0 : vector<16x32xf32>, i32 -> vector<16x32xf32>
    %cst_123 = arith.constant 0.000000e+00 : f32
    %182 = vector.broadcast %cst_123 : f32 to vector<16x32xf32>
    %183 = arith.select %20, %181, %182 : vector<16x32xi1>, vector<16x32xf32>
    %184 = arith.addf %180, %183 : vector<16x32xf32>
    %185 = vector.broadcast %173 : vector<1x32xf32> to vector<16x32xf32>
    %186 = arith.addf %184, %185 : vector<16x32xf32>
    %187 = arith.addf %186, %140 : vector<16x32xf32>
    %cst_124 = arith.constant 0.000000e+00 : f32
    %188 = vector.broadcast %cst_124 : f32 to vector<16x32xf32>
    %189 = arith.maximumf %187, %188 : vector<16x32xf32>
    %190 = arith.truncf %189 : vector<16x32xf32> to vector<16x32xbf16>
    %c0_125 = arith.constant 0 : index
    %c0_126 = arith.constant 0 : index
    %191 = vector.load %arg6[%c0_125, %c0_126] : memref<32x4xbf16, #tpu.memory_space<vmem>>, vector<32x4xbf16>
    %cst_127 = arith.constant dense<0.000000e+00> : vector<16x4xf32>
    %192 = tpu.matmul %190, %191, %cst_127 {dimension_numbers = #tpu.dot_dimension_numbers<[1], [0], [0], [1], [0, 0, 1, 1], [], []>} : vector<16x32xbf16>, vector<32x4xbf16>, vector<16x4xf32> -> vector<16x4xf32>
    %c0_128 = arith.constant 0 : index
    %c0_129 = arith.constant 0 : index
    %193 = vector.load %arg7[%c0_128, %c0_129] : memref<1x4xf32, #tpu.memory_space<vmem>>, vector<1x4xf32>
    %194 = vector.broadcast %193 : vector<1x4xf32> to vector<16x4xf32>
    %195 = arith.addf %192, %194 : vector<16x4xf32>
    %c0_130 = arith.constant 0 : index
    %c0_131 = arith.constant 0 : index
    %196 = vector.load %arg8[%c0_130, %c0_131] : memref<16x4xf32, #tpu.memory_space<vmem>>, vector<16x4xf32>
    tpu.vector_store %arg8[%c0_130, %c0_131], %195 {strides = array<i32>} : memref<16x4xf32, #tpu.memory_space<vmem>>, vector<16x4xf32>,
    return
  }
  func.func @transform_0(%arg0: i32) -> (i32, i32) {
    %c0_i32 = arith.constant 0 : i32
    %c0_i32_0 = arith.constant 0 : i32
    return %arg0, %c0_i32 : i32, i32
  }
  func.func @transform_1(%arg0: i32) -> (i32, i32, i32) {
    %c0_i32 = arith.constant 0 : i32
    %c0_i32_0 = arith.constant 0 : i32
    %c0_i32_1 = arith.constant 0 : i32
    %c0_i32_2 = arith.constant 0 : i32
    return %c0_i32, %c0_i32_0, %c0_i32_1 : i32, i32, i32
  }
  func.func @transform_2(%arg0: i32) -> (i32, i32) {
    %c0_i32 = arith.constant 0 : i32
    %c0_i32_0 = arith.constant 0 : i32
    %c0_i32_1 = arith.constant 0 : i32
    return %c0_i32, %c0_i32_0 : i32, i32
  }
  func.func @transform_3(%arg0: i32) -> (i32, i32, i32) {
    %c0_i32 = arith.constant 0 : i32
    %c0_i32_0 = arith.constant 0 : i32
    %c0_i32_1 = arith.constant 0 : i32
    %c0_i32_2 = arith.constant 0 : i32
    return %c0_i32, %c0_i32_0, %c0_i32_1 : i32, i32, i32
  }
  func.func @transform_4(%arg0: i32) -> (i32, i32, i32) {
    %c0_i32 = arith.constant 0 : i32
    %c0_i32_0 = arith.constant 0 : i32
    %c0_i32_1 = arith.constant 0 : i32
    %c0_i32_2 = arith.constant 0 : i32
    return %c0_i32, %c0_i32_0, %c0_i32_1 : i32, i32, i32
  }
  func.func @transform_5(%arg0: i32) -> (i32, i32) {
    %c0_i32 = arith.constant 0 : i32
    %c0_i32_0 = arith.constant 0 : i32
    %c0_i32_1 = arith.constant 0 : i32
    return %c0_i32, %c0_i32_0 : i32, i32
  }
  func.func @transform_6(%arg0: i32) -> (i32, i32) {
    %c0_i32 = arith.constant 0 : i32
    %c0_i32_0 = arith.constant 0 : i32
    %c0_i32_1 = arith.constant 0 : i32
    return %c0_i32, %c0_i32_0 : i32, i32
  }
  func.func @transform_7(%arg0: i32) -> (i32, i32) {
    %c0_i32 = arith.constant 0 : i32
    %c0_i32_0 = arith.constant 0 : i32
    return %arg0, %c0_i32 : i32, i32
  }
}

</mosaic_0001>

<bundles_post_ra>
// kernel: simple_resnet_forward.1
= control target key start
LH: loop header
LB: loop body
LE: loop exit
PB: predicated region body
PF: predicated region fallthrough
CT: control target
= control target key end

     0   :  { %s2324_s24 = smov 0   ;;  %s2741_s0 = inlined_call_operand.vmem [shape: f32[32,4], index: 0, kind: input, shape index: {}]   ;;  %s2742_s1 = inlined_call_operand.vmem [shape: bf16[3,4,32], index: 1, kind: input, shape index: {}]   ;;  %s2743_s2 = inlined_call_operand.vmem [shape: f32[1,32], index: 2, kind: input, shape index: {}]   ;;  %s2744_s3 = inlined_call_operand.vmem [shape: bf16[18,32,32], index: 3, kind: input, shape index: {}]   ;;  %s2745_s4 = inlined_call_operand.vmem [shape: f32[6,1,32], index: 4, kind: input, shape index: {}]   ;;  %s2746_s5 = inlined_call_operand.vmem [shape: bf16[32,4], index: 5, kind: input, shape index: {}]   ;;  %s2747_s6 = inlined_call_operand.vmem [shape: f32[1,4], index: 6, kind: input, shape index: {}]   ;;  %s2748_s7 = inlined_call_operand.vmem [shape: f32[32,4], index: 7, kind: output, shape index: {}]  }
   0x1 LB: > { %s1839_s25 = sadd.s32 4294967295, %s2280_s24   ;;  %p1843_p0 = scmp.ge.s32.totalorder %s2280_s24, 1  ;;  %s2280_s24 = sphi %s2324_s24, %s17_s24  }
   0x2   : > { %p238_p1 = scmp.lt.s32.totalorder %s2280_s24, 3 }
   0x4   : > { %p239_p2 = pnand %p1843_p0, %p238_p1 }
   0x5   : > { %s1844_s30 = sshll.u32 (!%p239_p2), %s1839_s25, 1 }
   0x6   : > { %242 = sbr.rel (%p239_p2) target bundleno = 1727 (0x6bf), region = 48  ;;  %p271_p3 = scmp.lt.s32.totalorder (!%p239_p2), %s1844_s30, 3 }
   0xb   : > { %v317_v0 = vld [vmem:[%s2742_s1] sm:$0x3]  ;;  %vm327_vm0 = vcmask 1041408   ;;  %v1849_v1 = vld [vmem:[%s2742_s1 + $0x4] sm:$0x3]  ;;  %v2282_v2 = vmov 0.0   ;;  %v283_v14 = vlaneseq }
   0xc   : > { %2056 = vmatprep.subr.bf16.mxu0 %v2282_v2  ;;  %v329_v3 = vsel %vm327_vm0, %v317_v0, 0  ;;  %2062 = vmatprep.subr.bf16.mxu1 %v2282_v2  ;;  %v373_v4 = vsel %vm327_vm0, %v1849_v1, 0  ;;  %vm2283_vm1 = vmmov 0   ;;  %v1848_v5 = vld [vmem:[%s2742_s1 + $0x2] sm:$0x3]  ;;  %s2754_s30 = smov (!%p271_p3, %s1844_s30), 3 }
   0xd   : > { %2057 = vmatpush3.bf16.msra.mxu0 %v329_v3  ;;  %2063 = vmatpush3.bf16.msra.mxu1 %v373_v4  ;;  %s1845_s10 = sshll.u32 %s2754_s30, 3  ;;  %vm323_vm2 = vcmask 31744   ;;  %v424_v8 = vsel %vm327_vm0, %v1848_v5, 0  ;;  %v2236_v10 = vld [vmem:[%s2744_s3 + $0x8] sm:$0xff]   ;;  %v2238_v12 = vld [vmem:[%s2744_s3] sm:$0xff]   ;;  %v2386_v15 = vshrl.u32 %v283_v14, 7 }
   0xe   : > { %2058 = vmatprep.mubr.msk.bf16.mxu0 %vm2283_vm1, %v2282_v2  ;;  %2064 = vmatprep.mubr.msk.bf16.mxu1 %vm2283_vm1, %v2282_v2  ;;  %s274_s13 = scalar_lea.vmem %s2741_s0, %s1845_s10  ;;  %v2237_v11 = vld [vmem:[%s2744_s3 + $0x28] sm:$0xff]   ;;  %v2239_v13 = vld [vmem:[%s2744_s3 + $0x20] sm:$0xff]   ;;  %vm512_vm7 = vcmask 261120   ;;  %v2240_v50 = vld [vmem:[%s2744_s3 + $0x18] sm:$0xff]   ;;  %s280_s29 = scalar_lea.vmem %s2748_s7, %s1845_s10 }
   0xf   : > { %2068 = vmatprep.subr.bf16.mxu0 %v2282_v2  ;;  %2074 = vmatprep.subr.bf16.mxu1 %v2282_v2  ;;  %v314_v6 = vld [vmem:[%s274_s13] sm:$0xff]  ;;  %v315_v7 = vld [vmem:[%s274_s13 + $0x8] sm:$0xff]  ;;  %v290_v18 = vand.u32 15, %v2386_v15  ;;  %v285_v21 = vadd.s32 8, %v2386_v15  ;;  %vm418_vm3 = vcmp.lt.s32.totalorder %v2386_v15, 1  ;;  %vm469_vm5 = vcmp.lt.s32.totalorder %v2386_v15, 7 }
  0x10   : > { %v316_v9 = vpack.c.bf16 %v315_v7, %v314_v6  ;;  %v1853_v44 = vld [vmem:[%s2743_s2] ss:$0 sm:$0xff]  ;;  %v2241_v52 = vld [vmem:[%s2744_s3 + $0x10] sm:$0xff]   ;;  %v2242_v53 = vld [vmem:[%s2744_s3 + $0x38] sm:$0xff]  }
  0x11   : > { %vm2391_vm4 = vcmp.ne.s32.totalorder %v290_v18, 0  ;;  %v297_v32 = vand.u32 15, %v285_v21  ;;  %v2243_v54 = vld [vmem:[%s2744_s3 + $0x58] sm:$0xff]   ;;  %v2244_v55 = vld [vmem:[%s2744_s3 + $0x30] sm:$0xff]   ;;  %v1871_v14 = vld [vmem:[%s2745_s4] ss:$0 sm:$0xff] }
  0x12   : > { %2059 = vmatmul.mubr.msk.bf16.vlgmr.msra.gmra.mxu0 %vm323_vm2, %v316_v9  ;;  %2065 = vmatmul.mubr.msk.bf16.vlgmr.msra.gmra.mxu1 %vm323_vm2, %v316_v9  ;;  %v2245_v56 = vld [vmem:[%s2744_s3 + $0x50] sm:$0xff]  }
  0x13   : > { %2069 = vmatpush3.bf16.msra.mxu0 %v424_v8  ;;  %2070 = vmatprep.mubr.msk.bf16.mxu0 %vm2283_vm1, %v2282_v2  ;;  %vm2402_vm6 = vcmp.ne.s32.totalorder %v297_v32, 15  ;;  %v2250_v32 = vld [vmem:[%s2744_s3 + $0x60] sm:$0xff]  }
  0x14   : > { %2082 = vmatprep.subr.bf16.mxu0 %v2282_v2  ;;  %2078 = vmatprep.mubr.msk.bf16.mxu1 %vm2283_vm1, %v2282_v2 }
  0x15   : > { %2075 = vmatpush3.bf16.msra.mxu1 %v2236_v10 }
  0x16   : > { %2076 = vmatprep.subr.bf16.mxu1 %v2282_v2 }
  0x19   : > { %2077 = vmatpush3.bf16.msra.mxu1 %v2238_v12 }
  0x1a   : > { %2071 = vmatmul.mubr.msk.bf16.vlgmr.msra.gmra.mxu0 %vm323_vm2, %v316_v9  ;;  %2090 = vmatprep.subr.bf16.mxu1 %v2282_v2 }
  0x1b   : > { %2086 = vmatprep.mubr.msk.bf16.mxu0 %vm2283_vm1, %v2282_v2  ;;  %2083 = vmatpush3.bf16.msra.mxu0 %v2237_v11 }
  0x1c   : > { %2084 = vmatprep.subr.bf16.mxu0 %v2282_v2 }
  0x1f   : > { %2085 = vmatpush3.bf16.msra.mxu0 %v2239_v13 }
  0x20   : > { %2098 = vmatprep.subr.bf16.mxu0 %v2282_v2 }
  0xd2   : > { %v365_v16 = vpop.f32.mrf.mxu0  ;;  %v409_v17 = vpop.f32.mrf.mxu1 }
  0xd3   : > { %v416_v24 = vrot.slane %v365_v16, 7  ;;  %v467_v27 = vrot.slane %v409_v17, 1 }
  0xd4   : > { %v2060_v19 = vpop.f32.mrf.mxu0  ;;  %v2066_v20 = vpop.f32.mrf.mxu1 }
  0xd6   : > { %v368_v22 = vpop.f32.mrf.mxu0  ;;  %v412_v23 = vpop.f32.mrf.mxu1 }
  0xd7   : > { %v417_v25 = vrot.slane %v368_v22, 7  ;;  %v468_v28 = vrot.slane %v412_v23, 1 }
  0xd8   : > { %v2061_v29 = vpop.f32.mrf.mxu0  ;;  %v2067_v30 = vpop.f32.mrf.mxu1 }
  0xd9   : > { %v420_v31 = vsel %vm418_vm3, %v417_v25, %v416_v24  ;;  %v470_v36 = vsel %vm469_vm5, %v467_v27, %v468_v28  ;;  %v471_v39 = vsel %vm469_vm5, %v468_v28, %v467_v27  ;;  %v419_v40 = vsel %vm418_vm3, %v416_v24, %v417_v25  ;;  %v2246_v27 = vld [vmem:[%s2744_s3 + $0x48] sm:$0xff]   ;;  %v2247_v29 = vld [vmem:[%s2744_s3 + $0x40] sm:$0xff]  }
  0xda   : > { %v421_v33 = vsel %vm2391_vm4, %v420_v31, 0.0  ;;  %v460_v34 = vpop.f32.mrf.mxu0  ;;  %v473_v45 = vsel %vm2402_vm6, %v471_v39, 0.0  ;;  %v2248_v30 = vld [vmem:[%s2744_s3 + $0x68] sm:$0xff]  }
  0xdb   : > { %v461_v35 = vadd.f32 %v460_v34, %v421_v33  ;;  %v2249_v31 = vld [vmem:[%s2744_s3 + $0x88] sm:$0xff]   ;;  %v2251_v33 = vld [vmem:[%s2744_s3 + $0x80] sm:$0xff]  }
  0xdc   : > { %v2072_v37 = vpop.f32.mrf.mxu0 }
  0xdd   : > { %v474_v42 = vadd.f32 %v470_v36, %v461_v35 }
  0xde   : > { %v463_v41 = vpop.f32.mrf.mxu0 }
  0xdf   : > { %v464_v43 = vadd.f32 %v463_v41, %v419_v40  ;;  %v2415_v48 = vadd.f32 %v1853_v44, %v474_v42 }
  0xe0   : > { %v2073_v46 = vpop.f32.mrf.mxu0 }
  0xe1   : > { %v475_v47 = vadd.f32 %v473_v45, %v464_v43 }
  0xe3   : > { %v2417_v49 = vadd.f32 %v1853_v44, %v475_v47 }
  0xe5   : > { %v484_v51 = vpack.c.bf16 %v2417_v49, %v2415_v48 }
  0xe7   : > { %2079 = vmatmul.mubr.msk.bf16.vlgmr.msra.gmra.mxu1 %vm512_vm7, %v484_v51  ;;  %2087 = vmatmul.mubr.msk.bf16.vlgmr.msra.gmra.mxu0 %vm512_vm7, %v484_v51 }
  0xe8   : > { %2091 = vmatpush3.bf16.msra.mxu1 %v2240_v50  ;;  %2094 = vmatprep.mubr.msk.bf16.mxu1 %vm2283_vm1, %v2282_v2 }
  0xe9   : > { %2092 = vmatprep.subr.bf16.mxu1 %v2282_v2  ;;  %2102 = vmatprep.mubr.msk.bf16.mxu0 %vm2283_vm1, %v2282_v2 }
  0xea   : > { %2099 = vmatpush3.bf16.msra.mxu0 %v2242_v53  ;;  %v1894_v53 = vld [vmem:[%s2745_s4 + $0x1] ss:$0 sm:$0xff] }
  0xeb   : > { %2100 = vmatprep.subr.bf16.mxu0 %v2282_v2 }
  0xec   : > { %2093 = vmatpush3.bf16.msra.mxu1 %v2241_v52 }
  0xed   : > { %2106 = vmatprep.subr.bf16.mxu1 %v2282_v2 }
  0xee   : > { %2101 = vmatpush3.bf16.msra.mxu0 %v2244_v55 }
  0xef   : > { %2095 = vmatmul.mubr.msk.bf16.vlgmr.msra.gmra.mxu1 %vm512_vm7, %v484_v51  ;;  %2114 = vmatprep.subr.bf16.mxu0 %v2282_v2 }
  0xf0   : > { %2110 = vmatprep.mubr.msk.bf16.mxu1 %vm2283_vm1, %v2282_v2  ;;  %2107 = vmatpush3.bf16.msra.mxu1 %v2243_v54 }
  0xf1   : > { %2108 = vmatprep.subr.bf16.mxu1 %v2282_v2 }
  0xf4   : > { %2109 = vmatpush3.bf16.msra.mxu1 %v2245_v56 }
  0xf5   : > { %2122 = vmatprep.subr.bf16.mxu1 %v2282_v2 }
 0x1a7   : > { %v550_v57 = vpop.f32.mrf.mxu1  ;;  %v603_v58 = vpop.f32.mrf.mxu0 }
 0x1a8   : > { %v610_v63 = vrot.slane %v550_v57, 7  ;;  %v669_v6 = vrot.slane %v603_v58, 1 }
 0x1a9   : > { %v2080_v59 = vpop.f32.mrf.mxu1  ;;  %v2088_v60 = vpop.f32.mrf.mxu0 }
 0x1ab   : > { %v553_v61 = vpop.f32.mrf.mxu1  ;;  %v606_v62 = vpop.f32.mrf.mxu0 }
 0x1ac   : > { %v611_v0 = vrot.slane %v553_v61, 7  ;;  %v670_v1 = vrot.slane %v606_v62, 1 }
 0x1ad   : > { %v2081_v3 = vpop.f32.mrf.mxu1  ;;  %v2089_v4 = vpop.f32.mrf.mxu0 }
 0x1ae   : > { %v613_v5 = vsel %vm418_vm3, %v611_v0, %v610_v63  ;;  %v671_v10 = vsel %vm469_vm5, %v669_v6, %v670_v1  ;;  %v672_v13 = vsel %vm469_vm5, %v670_v1, %v669_v6  ;;  %v612_v16 = vsel %vm418_vm3, %v610_v63, %v611_v0 }
 0x1af   : > { %v614_v7 = vsel %vm2391_vm4, %v613_v5, 0.0  ;;  %v662_v8 = vpop.f32.mrf.mxu1  ;;  %v674_v19 = vsel %vm2402_vm6, %v672_v13, 0.0 }
 0x1b0   : > { %v663_v9 = vadd.f32 %v662_v8, %v614_v7  ;;  %v2252_v7 = vld [vmem:[%s2744_s3 + $0x78] sm:$0xff]  }
 0x1b1   : > { %v2096_v11 = vpop.f32.mrf.mxu1 }
 0x1b2   : > { %v675_v12 = vadd.f32 %v671_v10, %v663_v9  ;;  %v2255_v9 = vld [vmem:[%s2744_s3 + $0xb8] sm:$0xff]   ;;  %v2256_v10 = vld [vmem:[%s2744_s3 + $0x90] sm:$0xff]  }
 0x1b3   : > { %v665_v17 = vpop.f32.mrf.mxu1  ;;  %v2257_v11 = vld [vmem:[%s2744_s3 + $0xb0] sm:$0xff]  }
 0x1b4   : > { %v666_v18 = vadd.f32 %v665_v17, %v612_v16  ;;  %v683_v21 = vadd.f32 %v1871_v14, %v675_v12 }
 0x1b5   : > { %v2097_v20 = vpop.f32.mrf.mxu1 }
 0x1b6   : > { %v676_v22 = vadd.f32 %v674_v19, %v666_v18  ;;  %v685_v24 = vmax.f32 %v683_v21, 0.0 }
 0x1b8   : > { %v684_v23 = vadd.f32 %v1871_v14, %v676_v22 }
 0x1ba   : > { %v686_v25 = vmax.f32 %v684_v23, 0.0 }
 0x1bc   : > { %v687_v28 = vpack.c.bf16 %v686_v25, %v685_v24 }
 0x1be   : > { %2103 = vmatmul.mubr.msk.bf16.vlgmr.msra.gmra.mxu0 %vm512_vm7, %v687_v28  ;;  %2111 = vmatmul.mubr.msk.bf16.vlgmr.msra.gmra.mxu1 %vm512_vm7, %v687_v28 }
 0x1bf   : > { %2115 = vmatpush3.bf16.msra.mxu0 %v2246_v27  ;;  %2118 = vmatprep.mubr.msk.bf16.mxu0 %vm2283_vm1, %v2282_v2 }
 0x1c0   : > { %2116 = vmatprep.subr.bf16.mxu0 %v2282_v2  ;;  %2126 = vmatprep.mubr.msk.bf16.mxu1 %vm2283_vm1, %v2282_v2 }
 0x1c1   : > { %2123 = vmatpush3.bf16.msra.mxu1 %v2248_v30 }
 0x1c2   : > { %2124 = vmatprep.subr.bf16.mxu1 %v2282_v2 }
 0x1c3   : > { %2117 = vmatpush3.bf16.msra.mxu0 %v2247_v29 }
 0x1c4   : > { %2130 = vmatprep.subr.bf16.mxu0 %v2282_v2 }
 0x1c5   : > { %2125 = vmatpush3.bf16.msra.mxu1 %v2250_v32 }
 0x1c6   : > { %2119 = vmatmul.mubr.msk.bf16.vlgmr.msra.gmra.mxu0 %vm512_vm7, %v687_v28  ;;  %2138 = vmatprep.subr.bf16.mxu1 %v2282_v2 }
 0x1c7   : > { %2134 = vmatprep.mubr.msk.bf16.mxu0 %vm2283_vm1, %v2282_v2  ;;  %2131 = vmatpush3.bf16.msra.mxu0 %v2249_v31 }
 0x1c8   : > { %2132 = vmatprep.subr.bf16.mxu0 %v2282_v2 }
 0x1cb   : > { %2133 = vmatpush3.bf16.msra.mxu0 %v2251_v33 }
 0x1cc   : > { %2146 = vmatprep.subr.bf16.mxu0 %v2282_v2 }
 0x27e   : > { %v754_v34 = vpop.f32.mrf.mxu0  ;;  %v807_v35 = vpop.f32.mrf.mxu1 }
 0x27f   : > { %v814_v41 = vrot.slane %v754_v34, 7  ;;  %v873_v47 = vrot.slane %v807_v35, 1  ;;  %v1917_v34 = vld [vmem:[%s2745_s4 + $0x2] ss:$0 sm:$0xff] }
 0x280   : > { %v2104_v36 = vpop.f32.mrf.mxu0  ;;  %v2112_v37 = vpop.f32.mrf.mxu1 }
 0x282   : > { %v757_v39 = vpop.f32.mrf.mxu0  ;;  %v810_v40 = vpop.f32.mrf.mxu1 }
 0x283   : > { %v815_v42 = vrot.slane %v757_v39, 7  ;;  %v874_v43 = vrot.slane %v810_v40, 1 }
 0x284   : > { %v2105_v44 = vpop.f32.mrf.mxu0  ;;  %v2113_v45 = vpop.f32.mrf.mxu1 }
 0x285   : > { %v817_v46 = vsel %vm418_vm3, %v815_v42, %v814_v41  ;;  %v875_v54 = vsel %vm469_vm5, %v873_v47, %v874_v43  ;;  %v876_v57 = vsel %vm469_vm5, %v874_v43, %v873_v47  ;;  %v816_v58 = vsel %vm418_vm3, %v814_v41, %v815_v42 }
 0x286   : > { %v818_v50 = vsel %vm2391_vm4, %v817_v46, 0.0  ;;  %v866_v51 = vpop.f32.mrf.mxu0  ;;  %v878_v62 = vsel %vm2402_vm6, %v876_v57, 0.0  ;;  %v2258_v46 = vld [vmem:[%s2744_s3 + $0xa8] sm:$0xff]  }
 0x287   : > { %v867_v52 = vadd.f32 %v866_v51, %v818_v50  ;;  %v2259_v50 = vld [vmem:[%s2744_s3 + $0xa0] sm:$0xff]   ;;  %v2260_v51 = vld [vmem:[%s2744_s3 + $0xc8] sm:$0xff]  }
 0x288   : > { %v2120_v55 = vpop.f32.mrf.mxu0 }
 0x289   : > { %v879_v56 = vadd.f32 %v875_v54, %v867_v52  ;;  %v2261_v52 = vld [vmem:[%s2744_s3 + $0xe8] sm:$0xff]   ;;  %v2263_v54 = vld [vmem:[%s2744_s3 + $0xe0] sm:$0xff]  }
 0x28a   : > { %v869_v59 = vpop.f32.mrf.mxu0 }
 0x28b   : > { %v887_v60 = vadd.f32 %v1894_v53, %v879_v56  ;;  %v870_v61 = vadd.f32 %v869_v59, %v816_v58 }
 0x28c   : > { %v2121_v63 = vpop.f32.mrf.mxu0 }
 0x28d   : > { %v880_v0 = vadd.f32 %v878_v62, %v870_v61  ;;  %v2518_v1 = vadd.f32 %v887_v60, %v2415_v48  ;;  %v2253_v48 = vld [vmem:[%s2744_s3 + $0x70] sm:$0xff]  }
 0x28f   : > { %v888_v3 = vadd.f32 %v1894_v53, %v880_v0  ;;  %v891_v5 = vmax.f32 %v2518_v1, 0.0  ;;  %v2262_v53 = vld [vmem:[%s2744_s3 + $0xc0] sm:$0xff]  }
 0x291   : > { %v2521_v4 = vadd.f32 %v888_v3, %v2417_v49  ;;  %v2254_v49 = vld [vmem:[%s2744_s3 + $0x98] sm:$0xff]  }
 0x293   : > { %v892_v6 = vmax.f32 %v2521_v4, 0.0  ;;  %v2265_v4 = vld [vmem:[%s2744_s3 + $0xd0] sm:$0xff]  }
 0x295   : > { %v893_v8 = vpack.c.bf16 %v892_v6, %v891_v5 }
 0x297   : > { %2127 = vmatmul.mubr.msk.bf16.vlgmr.msra.gmra.mxu1 %vm512_vm7, %v893_v8  ;;  %2135 = vmatmul.mubr.msk.bf16.vlgmr.msra.gmra.mxu0 %vm512_vm7, %v893_v8 }
 0x298   : > { %2139 = vmatpush3.bf16.msra.mxu1 %v2252_v7  ;;  %2142 = vmatprep.mubr.msk.bf16.mxu1 %vm2283_vm1, %v2282_v2 }
 0x299   : > { %2140 = vmatprep.subr.bf16.mxu1 %v2282_v2  ;;  %2150 = vmatprep.mubr.msk.bf16.mxu0 %vm2283_vm1, %v2282_v2 }
 0x29a   : > { %2147 = vmatpush3.bf16.msra.mxu0 %v2254_v49 }
 0x29b   : > { %2148 = vmatprep.subr.bf16.mxu0 %v2282_v2 }
 0x29c   : > { %2141 = vmatpush3.bf16.msra.mxu1 %v2253_v48 }
 0x29d   : > { %2154 = vmatprep.subr.bf16.mxu1 %v2282_v2 }
 0x29e   : > { %2149 = vmatpush3.bf16.msra.mxu0 %v2256_v10  ;;  %v1940_v10 = vld [vmem:[%s2745_s4 + $0x3] ss:$0 sm:$0xff] }
 0x29f   : > { %2143 = vmatmul.mubr.msk.bf16.vlgmr.msra.gmra.mxu1 %vm512_vm7, %v893_v8  ;;  %2162 = vmatprep.subr.bf16.mxu0 %v2282_v2 }
 0x2a0   : > { %2158 = vmatprep.mubr.msk.bf16.mxu1 %vm2283_vm1, %v2282_v2  ;;  %2155 = vmatpush3.bf16.msra.mxu1 %v2255_v9 }
 0x2a1   : > { %2156 = vmatprep.subr.bf16.mxu1 %v2282_v2 }
 0x2a4   : > { %2157 = vmatpush3.bf16.msra.mxu1 %v2257_v11 }
 0x2a5   : > { %2170 = vmatprep.subr.bf16.mxu1 %v2282_v2 }
 0x357   : > { %v960_v12 = vpop.f32.mrf.mxu1  ;;  %v1013_v13 = vpop.f32.mrf.mxu0 }
 0x358   : > { %v1020_v19 = vrot.slane %v960_v12, 7  ;;  %v1079_v25 = vrot.slane %v1013_v13, 1 }
 0x359   : > { %v2128_v14 = vpop.f32.mrf.mxu1  ;;  %v2136_v16 = vpop.f32.mrf.mxu0 }
 0x35b   : > { %v963_v17 = vpop.f32.mrf.mxu1  ;;  %v1016_v18 = vpop.f32.mrf.mxu0 }
 0x35c   : > { %v1021_v20 = vrot.slane %v963_v17, 7  ;;  %v1080_v21 = vrot.slane %v1016_v18, 1 }
 0x35d   : > { %v2129_v22 = vpop.f32.mrf.mxu1  ;;  %v2137_v23 = vpop.f32.mrf.mxu0 }
 0x35e   : > { %v1023_v24 = vsel %vm418_vm3, %v1021_v20, %v1020_v19  ;;  %v1081_v30 = vsel %vm469_vm5, %v1079_v25, %v1080_v21  ;;  %v1082_v33 = vsel %vm469_vm5, %v1080_v21, %v1079_v25  ;;  %v1022_v35 = vsel %vm418_vm3, %v1020_v19, %v1021_v20 }
 0x35f   : > { %v1024_v27 = vsel %vm2391_vm4, %v1023_v24, 0.0  ;;  %v1072_v28 = vpop.f32.mrf.mxu1  ;;  %v1084_v39 = vsel %vm2402_vm6, %v1082_v33, 0.0 }
 0x360   : > { %v1073_v29 = vadd.f32 %v1072_v28, %v1024_v27 }
 0x361   : > { %v2144_v31 = vpop.f32.mrf.mxu1 }
 0x362   : > { %v1085_v32 = vadd.f32 %v1081_v30, %v1073_v29  ;;  %v2264_v29 = vld [vmem:[%s2744_s3 + $0xd8] sm:$0xff]   ;;  %v2268_v30 = vld [vmem:[%s2744_s3 + $0xf0] sm:$0xff]  }
 0x363   : > { %v1075_v36 = vpop.f32.mrf.mxu1  ;;  %v2269_v31 = vld [vmem:[%s2744_s3 + $0x110] sm:$0xff]  }
 0x364   : > { %v1076_v37 = vadd.f32 %v1075_v36, %v1022_v35  ;;  %v1093_v41 = vadd.f32 %v1917_v34, %v1085_v32 }
 0x365   : > { %v2145_v40 = vpop.f32.mrf.mxu1 }
 0x366   : > { %v1086_v42 = vadd.f32 %v1084_v39, %v1076_v37  ;;  %v1095_v44 = vmax.f32 %v1093_v41, 0.0 }
 0x368   : > { %v1094_v43 = vadd.f32 %v1917_v34, %v1086_v42 }
 0x36a   : > { %v1096_v45 = vmax.f32 %v1094_v43, 0.0 }
 0x36c   : > { %v1097_v47 = vpack.c.bf16 %v1096_v45, %v1095_v44 }
 0x36e   : > { %2151 = vmatmul.mubr.msk.bf16.vlgmr.msra.gmra.mxu0 %vm512_vm7, %v1097_v47  ;;  %2159 = vmatmul.mubr.msk.bf16.vlgmr.msra.gmra.mxu1 %vm512_vm7, %v1097_v47 }
 0x36f   : > { %2163 = vmatpush3.bf16.msra.mxu0 %v2258_v46  ;;  %2166 = vmatprep.mubr.msk.bf16.mxu0 %vm2283_vm1, %v2282_v2 }
 0x370   : > { %2164 = vmatprep.subr.bf16.mxu0 %v2282_v2  ;;  %2174 = vmatprep.mubr.msk.bf16.mxu1 %vm2283_vm1, %v2282_v2 }
 0x371   : > { %2171 = vmatpush3.bf16.msra.mxu1 %v2260_v51 }
 0x372   : > { %2172 = vmatprep.subr.bf16.mxu1 %v2282_v2 }
 0x373   : > { %2165 = vmatpush3.bf16.msra.mxu0 %v2259_v50 }
 0x374   : > { %2178 = vmatprep.subr.bf16.mxu0 %v2282_v2 }
 0x375   : > { %2173 = vmatpush3.bf16.msra.mxu1 %v2262_v53 }
 0x376   : > { %2167 = vmatmul.mubr.msk.bf16.vlgmr.msra.gmra.mxu0 %vm512_vm7, %v1097_v47  ;;  %2186 = vmatprep.subr.bf16.mxu1 %v2282_v2 }
 0x377   : > { %2182 = vmatprep.mubr.msk.bf16.mxu0 %vm2283_vm1, %v2282_v2  ;;  %2179 = vmatpush3.bf16.msra.mxu0 %v2261_v52 }
 0x378   : > { %2180 = vmatprep.subr.bf16.mxu0 %v2282_v2 }
 0x37b   : > { %2181 = vmatpush3.bf16.msra.mxu0 %v2263_v54 }
 0x37c   : > { %2194 = vmatprep.subr.bf16.mxu0 %v2282_v2 }
 0x42e   : > { %v1164_v55 = vpop.f32.mrf.mxu0  ;;  %v1217_v56 = vpop.f32.mrf.mxu1 }
 0x42f   : > { %v1224_v61 = vrot.slane %v1164_v55, 7  ;;  %v1283_v8 = vrot.slane %v1217_v56, 1  ;;  %v1963_v55 = vld [vmem:[%s2745_s4 + $0x4] ss:$0 sm:$0xff] }
 0x430   : > { %v2152_v57 = vpop.f32.mrf.mxu0  ;;  %v2160_v58 = vpop.f32.mrf.mxu1 }
 0x432   : > { %v1167_v59 = vpop.f32.mrf.mxu0  ;;  %v1220_v60 = vpop.f32.mrf.mxu1 }
 0x433   : > { %v1225_v62 = vrot.slane %v1167_v59, 7  ;;  %v1284_v63 = vrot.slane %v1220_v60, 1 }
 0x434   : > { %v2153_v0 = vpop.f32.mrf.mxu0  ;;  %v2161_v3 = vpop.f32.mrf.mxu1 }
 0x435   : > { %v1227_v7 = vsel %vm418_vm3, %v1225_v62, %v1224_v61  ;;  %v1285_v11 = vsel %vm469_vm5, %v1283_v8, %v1284_v63  ;;  %v1286_v14 = vsel %vm469_vm5, %v1284_v63, %v1283_v8  ;;  %v1226_v16 = vsel %vm418_vm3, %v1224_v61, %v1225_v62 }
 0x436   : > { %v1228_v48 = vsel %vm2391_vm4, %v1227_v7, 0.0  ;;  %v1276_v49 = vpop.f32.mrf.mxu0  ;;  %v1288_v20 = vsel %vm2402_vm6, %v1286_v14, 0.0  ;;  %v2270_v7 = vld [vmem:[%s2744_s3 + $0x108] sm:$0xff]  }
 0x437   : > { %v1277_v9 = vadd.f32 %v1276_v49, %v1228_v48  ;;  %v2271_v48 = vld [vmem:[%s2744_s3 + $0x100] sm:$0xff]   ;;  %v2272_v49 = vld [vmem:[%s2746_s5 + $0x8] sm:$0xff]  }
 0x438   : > { %v2168_v12 = vpop.f32.mrf.mxu0 }
 0x439   : > { %v1289_v13 = vadd.f32 %v1285_v11, %v1277_v9  ;;  %v2273_v9 = vld [vmem:[%s2746_s5] sm:$0xff]  }
 0x43a   : > { %v1279_v17 = vpop.f32.mrf.mxu0 }
 0x43b   : > { %v1297_v18 = vadd.f32 %v1940_v10, %v1289_v13  ;;  %v1280_v19 = vadd.f32 %v1279_v17, %v1226_v16 }
 0x43c   : > { %v2169_v21 = vpop.f32.mrf.mxu0 }
 0x43d   : > { %v1290_v22 = vadd.f32 %v1288_v20, %v1280_v19  ;;  %v2627_v23 = vadd.f32 %v1297_v18, %v891_v5  ;;  %v2266_v5 = vld [vmem:[%s2744_s3 + $0xf8] sm:$0xff]  }
 0x43f   : > { %v1298_v24 = vadd.f32 %v1940_v10, %v1290_v22  ;;  %v1301_v27 = vmax.f32 %v2627_v23, 0.0 }
 0x441   : > { %v2631_v25 = vadd.f32 %v1298_v24, %v892_v6  ;;  %v2267_v6 = vld [vmem:[%s2744_s3 + $0x118] sm:$0xff]  }
 0x443   : > { %v1302_v28 = vmax.f32 %v2631_v25, 0.0 }
 0x445   : > { %v1303_v1 = vpack.c.bf16 %v1302_v28, %v1301_v27 }
 0x447   : > { %2175 = vmatmul.mubr.msk.bf16.vlgmr.msra.gmra.mxu1 %vm512_vm7, %v1303_v1  ;;  %2183 = vmatmul.mubr.msk.bf16.vlgmr.msra.gmra.mxu0 %vm512_vm7, %v1303_v1 }
 0x448   : > { %2187 = vmatpush3.bf16.msra.mxu1 %v2264_v29  ;;  %2190 = vmatprep.mubr.msk.bf16.mxu1 %vm2283_vm1, %v2282_v2 }
 0x449   : > { %2188 = vmatprep.subr.bf16.mxu1 %v2282_v2  ;;  %2198 = vmatprep.mubr.msk.bf16.mxu0 %vm2283_vm1, %v2282_v2 }
 0x44a   : > { %2195 = vmatpush3.bf16.msra.mxu0 %v2266_v5 }
 0x44b   : > { %2196 = vmatprep.subr.bf16.mxu0 %v2282_v2 }
 0x44c   : > { %2189 = vmatpush3.bf16.msra.mxu1 %v2265_v4  ;;  %v1986_v4 = vld [vmem:[%s2745_s4 + $0x5] ss:$0 sm:$0xff] }
 0x44d   : > { %2202 = vmatprep.subr.bf16.mxu1 %v2282_v2 }
 0x44e   : > { %2197 = vmatpush3.bf16.msra.mxu0 %v2268_v30 }
 0x44f   : > { %2191 = vmatmul.mubr.msk.bf16.vlgmr.msra.gmra.mxu1 %vm512_vm7, %v1303_v1  ;;  %2210 = vmatprep.subr.bf16.mxu0 %v2282_v2 }
 0x450   : > { %2206 = vmatprep.mubr.msk.bf16.mxu1 %vm2283_vm1, %v2282_v2  ;;  %2203 = vmatpush3.bf16.msra.mxu1 %v2267_v6 }
 0x451   : > { %2204 = vmatprep.subr.bf16.mxu1 %v2282_v2 }
 0x454   : > { %2205 = vmatpush3.bf16.msra.mxu1 %v2269_v31 }
 0x455   : > { %2218 = vmatprep.subr.bf16.mxu1 %v2282_v2 }
 0x507   : > { %v1370_v32 = vpop.f32.mrf.mxu1  ;;  %v1423_v33 = vpop.f32.mrf.mxu0 }
 0x508   : > { %v1430_v39 = vrot.slane %v1370_v32, 7  ;;  %v1489_v45 = vrot.slane %v1423_v33, 1 }
 0x509   : > { %v2176_v34 = vpop.f32.mrf.mxu1  ;;  %v2184_v35 = vpop.f32.mrf.mxu0 }
 0x50b   : > { %v1373_v36 = vpop.f32.mrf.mxu1  ;;  %v1426_v37 = vpop.f32.mrf.mxu0 }
 0x50c   : > { %v1431_v40 = vrot.slane %v1373_v36, 7  ;;  %v1490_v41 = vrot.slane %v1426_v37, 1 }
 0x50d   : > { %v2177_v42 = vpop.f32.mrf.mxu1  ;;  %v2185_v43 = vpop.f32.mrf.mxu0 }
 0x50e   : > { %v1433_v44 = vsel %vm418_vm3, %v1431_v40, %v1430_v39  ;;  %v1491_v51 = vsel %vm469_vm5, %v1489_v45, %v1490_v41  ;;  %v1492_v54 = vsel %vm469_vm5, %v1490_v41, %v1489_v45  ;;  %v1432_v56 = vsel %vm418_vm3, %v1430_v39, %v1431_v40 }
 0x50f   : > { %v1434_v46 = vsel %vm2391_vm4, %v1433_v44, 0.0  ;;  %v1482_v47 = vpop.f32.mrf.mxu1  ;;  %v1494_v59 = vsel %vm2402_vm6, %v1492_v54, 0.0  ;;  %v1987_v44 = vld [vmem:[%s2747_s6] ss:$0 sm:$0xff] }
 0x510   : > { %v1483_v50 = vadd.f32 %v1482_v47, %v1434_v46 }
 0x511   : > { %v2192_v52 = vpop.f32.mrf.mxu1 }
 0x512   : > { %v1495_v53 = vadd.f32 %v1491_v51, %v1483_v50 }
 0x513   : > { %v1485_v57 = vpop.f32.mrf.mxu1 }
 0x514   : > { %v1486_v58 = vadd.f32 %v1485_v57, %v1432_v56  ;;  %v1503_v61 = vadd.f32 %v1963_v55, %v1495_v53 }
 0x515   : > { %v2193_v60 = vpop.f32.mrf.mxu1 }
 0x516   : > { %v1496_v62 = vadd.f32 %v1494_v59, %v1486_v58  ;;  %v1505_v0 = vmax.f32 %v1503_v61, 0.0 }
 0x518   : > { %v1504_v63 = vadd.f32 %v1963_v55, %v1496_v62 }
 0x51a   : > { %v1506_v3 = vmax.f32 %v1504_v63, 0.0 }
 0x51c   : > { %v1507_v8 = vpack.c.bf16 %v1506_v3, %v1505_v0 }
 0x51e   : > { %2199 = vmatmul.mubr.msk.bf16.vlgmr.msra.gmra.mxu0 %vm512_vm7, %v1507_v8  ;;  %2207 = vmatmul.mubr.msk.bf16.vlgmr.msra.gmra.mxu1 %vm512_vm7, %v1507_v8 }
 0x51f   : > { %2211 = vmatpush3.bf16.msra.mxu0 %v2270_v7  ;;  %2214 = vmatprep.mubr.msk.bf16.mxu0 %vm2283_vm1, %v2282_v2 }
 0x520   : > { %2212 = vmatprep.subr.bf16.mxu0 %v2282_v2  ;;  %2222 = vmatprep.mubr.msk.bf16.mxu1 %vm2283_vm1, %v2282_v2 }
 0x521   : > { %2219 = vmatpush3.bf16.msra.mxu1 %v2272_v49 }
 0x522   : > { %2220 = vmatprep.subr.bf16.mxu1 %v2282_v2 }
 0x523   : > { %2213 = vmatpush3.bf16.msra.mxu0 %v2271_v48 }
 0x525   : > { %2221 = vmatpush3.bf16.msra.mxu1 %v2273_v9 }
 0x526   : > { %2215 = vmatmul.mubr.msk.bf16.vlgmr.msra.gmra.mxu0 %vm512_vm7, %v1507_v8 }
 0x5de   : > { %v1574_v10 = vpop.f32.mrf.mxu0  ;;  %v1627_v11 = vpop.f32.mrf.mxu1 }
 0x5df   : > { %v1634_v17 = vrot.slane %v1574_v10, 7  ;;  %v1693_v2 = vrot.slane %v1627_v11, 1 }
 0x5e0   : > { %v2200_v12 = vpop.f32.mrf.mxu0  ;;  %v2208_v13 = vpop.f32.mrf.mxu1 }
 0x5e2   : > { %v1577_v14 = vpop.f32.mrf.mxu0  ;;  %v1630_v16 = vpop.f32.mrf.mxu1 }
 0x5e3   : > { %v1635_v18 = vrot.slane %v1577_v14, 7  ;;  %v1694_v19 = vrot.slane %v1630_v16, 1 }
 0x5e4   : > { %v2201_v20 = vpop.f32.mrf.mxu0  ;;  %v2209_v21 = vpop.f32.mrf.mxu1 }
 0x5e5   : > { %v1637_v22 = vsel %vm418_vm3, %v1635_v18, %v1634_v17  ;;  %v1695_v5 = vsel %vm469_vm5, %v1693_v2, %v1694_v19  ;;  %v1696_v31 = vsel %vm469_vm5, %v1694_v19, %v1693_v2  ;;  %v1636_v32 = vsel %vm418_vm3, %v1634_v17, %v1635_v18 }
 0x5e6   : > { %v1638_v24 = vsel %vm2391_vm4, %v1637_v22, 0.0  ;;  %v1686_v29 = vpop.f32.mrf.mxu0  ;;  %v1698_v35 = vsel %vm2402_vm6, %v1696_v31, 0.0 }
 0x5e7   : > { %v1687_v1 = vadd.f32 %v1686_v29, %v1638_v24 }
 0x5e8   : > { %v2216_v6 = vpop.f32.mrf.mxu0 }
 0x5e9   : > { %v1699_v30 = vadd.f32 %v1695_v5, %v1687_v1 }
 0x5ea   : > { %v1689_v26 = vpop.f32.mrf.mxu0 }
 0x5eb   : > { %v1707_v33 = vadd.f32 %v1986_v4, %v1699_v30  ;;  %v1690_v34 = vadd.f32 %v1689_v26, %v1636_v32 }
 0x5ec   : > { %v2217_v36 = vpop.f32.mrf.mxu0 }
 0x5ed   : > { %v1700_v37 = vadd.f32 %v1698_v35, %v1690_v34  ;;  %v1709_v39 = vadd.f32 %v1707_v33, %v1301_v27 }
 0x5ef   : > { %v1708_v40 = vadd.f32 %v1986_v4, %v1700_v37  ;;  %v1711_v42 = vmax.f32 %v1709_v39, 0.0 }
 0x5f1   : > { %v1710_v41 = vadd.f32 %v1708_v40, %v1302_v28 }
 0x5f3   : > { %v1712_v43 = vmax.f32 %v1710_v41, 0.0 }
 0x5f5   : > { %v1713_v15 = vpack.c.bf16 %v1712_v43, %v1711_v42 }
 0x5f7   : > { %2223 = vmatmul.mubr.msk.bf16.vlgmr.msra.gmra.mxu1 %vm512_vm7, %v1713_v15 }
 0x6b7   : > { %v1774_v38 = vpop.f32.mrf.mxu1 }
 0x6b8   : > { %v1775_v23 = vadd.f32 %v1987_v44, %v1774_v38 }
 0x6b9   : > { %v2224_v27 = vpop.f32.mrf.mxu1 }
 0x6ba   : > { %1781 = vst.msk [vmem:[%s280_s29] sm:$0xff] %vm323_vm2, %v1775_v23 }
 0x6bb   : > { %v1777_v25 = vpop.f32.mrf.mxu1 }
 0x6bc   : > { %v1778_v28 = vadd.f32 %v1987_v44, %v1777_v25 }
 0x6bd   : > { %v2225_v45 = vpop.f32.mrf.mxu1 }
 0x6be   : > { %1782 = vst.msk [vmem:[%s280_s29 + $0x8] sm:$0xff] %vm323_vm2, %v1778_v28 }
 0x6bf PF: > { %s17_s24 = sadd.s32 1, %s2280_s24  }
 0x6c0   : > { %p14_p4 = scmp.ge.s32.totalorder %s17_s24, 4  }
 0x6c2   :  { %16 = sbr.rel (!%p14_p4) target bundleno = 1 (0x1), region = 102 }

</bundles_post_ra>
